<compile_context>
chip_gen: v7x
topology: tpu7x:2x2x1
jax: 0.10.0
libtpu: 0.0.40
codegen_flags: <defaults>
</compile_context>

<pallas_src>
import functools

import jax
import jax.numpy as jnp
from jax.experimental import pallas as pl
from jax.experimental.pallas import tpu as pltpu

LANE = 128
NPART = 2                       # leading parallel axis (both TCs on v7x)
TARGET_BLOCK_BYTES = 1 << 20    # ~1 MiB per input block per grid step


def _round_up(x, m):
    return (x + m - 1) // m * m


def _abs_pow(d, l_num):
    """|d ** l_num| with cheap VPU lowering for small integer exponents."""
    if isinstance(l_num, int):
        if l_num == 1:
            return jnp.abs(d)
        p = d * d                       # l_num == 2: single VPU mul, no abs
        for _ in range(l_num - 2):
            p = p * d
        return p if (l_num % 2 == 0) else jnp.abs(p)
    # Non-integer exponent: match torch.abs((a-b)**l) exactly (this produces
    # NaN for negative differences, same as the PyTorch module).
    return jnp.abs(d ** l_num)


def _intensity_loss_kernel(gen_ref, gt_ref, o_ref, *,
                           l_num, inner, row_tile, n_valid, needs_mask):
    j = pl.program_id(1)

    @pl.when(j == 0)
    def _():
        o_ref[...] = jnp.zeros_like(o_ref)

    d = gen_ref[...].astype(jnp.float32) - gt_ref[...].astype(jnp.float32)
    v = _abs_pow(d, l_num)

    if needs_mask:
        # Intended (unclamped) global row of every element of this block.
        blk = pl.program_id(0) * inner + j
        row = blk * row_tile + jax.lax.broadcasted_iota(
            jnp.int32, (row_tile, LANE), 0)
        lane = jax.lax.broadcasted_iota(jnp.int32, (row_tile, LANE), 1)
        full_rows = n_valid // LANE
        rem = n_valid % LANE
        mask = (row < full_rows) | ((row == full_rows) & (lane < rem))
        v = jnp.where(mask, v, jnp.float32(0.0))

    # Fold the (row_tile, 128) tile into the resident (8, 128) accumulator:
    # pure element-wise vreg adds on the VPU.
    o_ref[...] += v.reshape(-1, 8, LANE).sum(axis=0)


def intensity_loss(gen_frames, gt_frames, l_num=2):
    """mean(abs((gen_frames - gt_frames) ** l_num)) -- scalar f32."""
    assert gen_frames.shape == gt_frames.shape
    if isinstance(l_num, int) and l_num <= 0:
        raise ValueError("l_num must be a positive exponent")
    n_valid = int(gen_frames.size)
    assert n_valid > 0

    # View inputs as a lane-dense (rows, 128) slab in their NATIVE dtype.
    # Pad only to the next multiple of 128 (and to at least 8 rows), and only
    # when actually needed -- for typical N*C*H*W frame shapes this is a
    # zero-copy reshape.
    gen_flat = gen_frames.reshape(-1)
    gt_flat = gt_frames.reshape(-1)
    rows = max(int(pl.cdiv(n_valid, LANE)), 8)
    padded = rows * LANE
    if padded != n_valid:
        gen_flat = jnp.pad(gen_flat, (0, padded - n_valid))
        gt_flat = jnp.pad(gt_flat, (0, padded - n_valid))
    gen2d = gen_flat.reshape(rows, LANE)
    gt2d = gt_flat.reshape(rows, LANE)

    # Row tile: ~1 MiB per input block, multiple of 8 (sublane), and no larger
    # than one partition's share of the rows.
    itemsize = jnp.dtype(gen2d.dtype).itemsize
    target_rows = max(8, TARGET_BLOCK_BYTES // (LANE * itemsize))
    rows_per_part = int(pl.cdiv(rows, NPART))
    row_tile = int(min(_round_up(target_rows, 8), _round_up(rows_per_part, 8)))
    inner = int(pl.cdiv(rows, NPART * row_tile))
    n_blocks = int(pl.cdiv(rows, row_tile))
    # Mask only if the grid's intended coverage exceeds the valid element count.
    needs_mask = (NPART * inner * row_tile * LANE) != n_valid

    def in_map(p, j):
        # Clamp so duplicated / out-of-range tail blocks stay in bounds; the
        # in-kernel mask zeroes their contribution.
        return (jnp.minimum(p * inner + j, n_blocks - 1), 0)

    kernel = functools.partial(
        _intensity_loss_kernel, l_num=l_num, inner=inner,
        row_tile=row_tile, n_valid=n_valid, needs_mask=needs_mask)

    partials = pl.pallas_call(
        kernel,
        out_shape=jax.ShapeDtypeStruct((NPART * 8, LANE), jnp.float32),
        grid_spec=pltpu.PrefetchScalarGridSpec(
            num_scalar_prefetch=0,
            grid=(NPART, inner),
            in_specs=[
                pl.BlockSpec((row_tile, LANE), in_map),
                pl.BlockSpec((row_tile, LANE), in_map),
            ],
            # One (8,128) partial-sum block per partition; resident across the
            # reduction axis j (acts as the accumulator).
            out_specs=pl.BlockSpec((8, LANE), lambda p, j: (p, 0)),
        ),
        compiler_params=pltpu.CompilerParams(
            dimension_semantics=("parallel", "arbitrary"),
        ),
    )(gen2d, gt2d)

    # Final cross-lane reduce + mean finalize on a tiny (NPART*8, 128) array.
    return jnp.sum(partials) / jnp.float32(n_valid)


if __name__ == "__main__":
    key = jax.random.PRNGKey(0)
    k1, k2 = jax.random.split(key)

    # NCHW inputs, matching the PyTorch module's expected frame tensors.
    gen = jax.random.normal(k1, (2, 4, 16, 16), dtype=jnp.float32)
    gt = jax.random.normal(k2, (2, 4, 16, 16), dtype=jnp.float32)

    l_num = 2  # module __init__ arg
    loss = intensity_loss(gen, gt, l_num=l_num)
    jax.block_until_ready(loss)

    ref = jnp.mean(jnp.abs((gen - gt) ** l_num))
    assert jnp.allclose(loss, ref, rtol=1e-5, atol=1e-6), (loss, ref)

    # Extra sanity check: misaligned size (exercises the pad + mask path) and
    # an odd exponent (exercises the abs-of-power path).
    g2 = jax.random.normal(k1, (1, 3, 17, 13), dtype=jnp.float32)
    t2 = jax.random.normal(k2, (1, 3, 17, 13), dtype=jnp.float32)
    loss2 = intensity_loss(g2, t2, l_num=3)
    jax.block_until_ready(loss2)
    ref2 = jnp.mean(jnp.abs((g2 - t2) ** 3))
    assert jnp.allclose(loss2, ref2, rtol=1e-5, atol=1e-6), (loss2, ref2)

    print("KERNEL_OK")
</pallas_src>

<mosaic_0001>
module attributes {stable_mosaic.version = 11 : i64} {
  func.func @_intensity_loss_kernel(%arg0: i32, %arg1: i32, %arg2: memref<8x128xf32, #tpu.memory_space<vmem>>, %arg3: memref<8x128xf32, #tpu.memory_space<vmem>>, %arg4: memref<8x128xf32, #tpu.memory_space<vmem>>) attributes {dimension_semantics = [#tpu.dimension_semantics<parallel>, #tpu.dimension_semantics<arbitrary>], iteration_bounds = array<i64: 2, 1>, scalar_prefetch = 0 : i64, scratch_operands = 0 : i64, tpu.core_type = #tpu.core_type<tc>, window_params = [{transform_indices = @transform_0, window_bounds = array<i64: 8, 128>}, {transform_indices = @transform_1, window_bounds = array<i64: 8, 128>}, {transform_indices = @transform_2, window_bounds = array<i64: 8, 128>}]} {
    %c0_i32 = arith.constant 0 : i32
    %0 = arith.cmpi eq, %arg1, %c0_i32 : i32
    %1 = arith.extui %0 : i1 to i32
    %c0_i32_0 = arith.constant 0 : i32
    %2 = arith.cmpi ne, %1, %c0_i32_0 : i32
    scf.if %2 {
      %cst_8 = arith.constant 0.000000e+00 : f32
      %12 = vector.broadcast %cst_8 : f32 to vector<8x128xf32>
      %c0_9 = arith.constant 0 : index
      %c0_10 = arith.constant 0 : index
      %13 = vector.load %arg4[%c0_9, %c0_10] : memref<8x128xf32, #tpu.memory_space<vmem>>, vector<8x128xf32>
      tpu.vector_store %arg4[%c0_9, %c0_10], %12 {strides = array<i32>} : memref<8x128xf32, #tpu.memory_space<vmem>>, vector<8x128xf32>,
    } else {
    }
    %c0 = arith.constant 0 : index
    %c0_1 = arith.constant 0 : index
    %3 = vector.load %arg2[%c0, %c0_1] : memref<8x128xf32, #tpu.memory_space<vmem>>, vector<8x128xf32>
    %c0_2 = arith.constant 0 : index
    %c0_3 = arith.constant 0 : index
    %4 = vector.load %arg3[%c0_2, %c0_3] : memref<8x128xf32, #tpu.memory_space<vmem>>, vector<8x128xf32>
    %5 = arith.subf %3, %4 : vector<8x128xf32>
    %6 = arith.mulf %5, %5 : vector<8x128xf32>
    %c0_4 = arith.constant 0 : index
    %c0_5 = arith.constant 0 : index
    %7 = vector.load %arg4[%c0_4, %c0_5] : memref<8x128xf32, #tpu.memory_space<vmem>>, vector<8x128xf32>
    %8 = vector.shape_cast %6 : vector<8x128xf32> to vector<1x8x128xf32>
    %cst = arith.constant dense<0.000000e+00> : vector<8x128xf32>
    %9 = vector.multi_reduction <add>, %8, %cst [0] : vector<1x8x128xf32> to vector<8x128xf32>
    %10 = arith.addf %7, %9 : vector<8x128xf32>
    %c0_6 = arith.constant 0 : index
    %c0_7 = arith.constant 0 : index
    %11 = vector.load %arg4[%c0_6, %c0_7] : memref<8x128xf32, #tpu.memory_space<vmem>>, vector<8x128xf32>
    tpu.vector_store %arg4[%c0_6, %c0_7], %10 {strides = array<i32>} : memref<8x128xf32, #tpu.memory_space<vmem>>, vector<8x128xf32>,
    return
  }
  func.func @transform_0(%arg0: i32, %arg1: i32) -> (i32, i32) {
    %c1_i32 = arith.constant 1 : i32
    %0 = arith.muli %arg0, %c1_i32 : i32
    %1 = arith.addi %0, %arg1 : i32
    %c1_i32_0 = arith.constant 1 : i32
    %2 = arith.minsi %1, %c1_i32_0 : i32
    %c0_i32 = arith.constant 0 : i32
    %c0_i32_1 = arith.constant 0 : i32
    return %2, %c0_i32 : i32, i32
  }
  func.func @transform_1(%arg0: i32, %arg1: i32) -> (i32, i32) {
    %c1_i32 = arith.constant 1 : i32
    %0 = arith.muli %arg0, %c1_i32 : i32
    %1 = arith.addi %0, %arg1 : i32
    %c1_i32_0 = arith.constant 1 : i32
    %2 = arith.minsi %1, %c1_i32_0 : i32
    %c0_i32 = arith.constant 0 : i32
    %c0_i32_1 = arith.constant 0 : i32
    return %2, %c0_i32 : i32, i32
  }
  func.func @transform_2(%arg0: i32, %arg1: i32) -> (i32, i32) {
    %c0_i32 = arith.constant 0 : i32
    %c0_i32_0 = arith.constant 0 : i32
    return %arg0, %c0_i32 : i32, i32
  }
}

</mosaic_0001>

<bundles_post_ra>
// kernel: tpu_custom_call.1
= control target key start
LH: loop header
LB: loop body
LE: loop exit
PB: predicated region body
PF: predicated region fallthrough
CT: control target
= control target key end

     0   :  { %7 = vsyncpa [#allocation3], 0  ;;  %s909_s0 = inlined_call_operand.hbm [shape: f32[16,128], index: 0, kind: input, shape index: {}]   ;;  %s910_s1 = inlined_call_operand.hbm [shape: f32[16,128], index: 1, kind: input, shape index: {}]   ;;  %s911_s2 = inlined_call_operand.hbm [shape: f32[16,128], index: 2, kind: output, shape index: {}]  }
   0x1   :  { %9 = vsyncpa [#allocation3 + $0x1], 0 }
   0x2   :  { %10 = vsyncpa [#allocation6], 0 }
   0x3   :  { %12 = vsyncpa [#allocation6 + $0x1], 0 }
   0x4   :  { %13 = vsyncpa [#allocation4], 0 }
   0x5   :  { %15 = vsyncpa [#allocation4 + $0x1], 0  ;;  %s658_s9 = smov 0   ;;  %s660_s10 = smov 0  }
   0x6   :  { %s662_s11 = smov 0   ;;  %s664_s12 = smov 0  }
   0x7   :  { %s666_s13 = smov 0   ;;  %s668_s14 = smov 0  }
   0x8   :  { %s670_s15 = smov 0   ;;  %s672_s16 = smov 0  }
   0x9   :  { %s674_s17 = smov 0  }
   0xa LB: > { %s360_s18 = sadd.s32 4294967295, %s638_s17   ;;  %s361_s19 = sadd.s32 4294967294, %s638_s17   ;;  %s638_s17 = sphi %s674_s17, %s21_s17   ;;  %s634_s16 = sphi %s672_s16, %s936_s16   ;;  %s630_s15 = sphi %s670_s15, %s935_s15   ;;  %s626_s14 = sphi %s668_s14, %s934_s14   ;;  %s622_s13 = sphi %s666_s13, %s933_s13   ;;  %s618_s12 = sphi %s664_s12, %s932_s12   ;;  %s614_s11 = sphi %s662_s11, %s931_s11   ;;  %s610_s10 = sphi %s660_s10, %s930_s10   ;;  %s606_s9 = sphi %s658_s9, %s929_s9  }
   0xb   : > { %s33_s20 = sadd.s32 1, %s634_s16  ;;  %p38_p0 = scmp.lt.s32.totalorder %s634_s16, 1 }
   0xc   : > { %p35_p1 = scmp.ge.s32.totalorder %s33_s20, 2  ;;  %s46_s21 = sadd.s32 1, %s626_s14 }
   0xd   : > { %s707_s22 = scalar_select %p38_p0, %s634_s16, 1 }
   0xe   : > { %s938_s20 = smov (%p35_p1, %s33_s20), 0  ;;  %p53_p2 = scmp.ne.s32.totalorder %s626_s14, %s622_s13 }
   0xf   : > { %p54_p3 = scmp.eq.s32.totalorder %s638_s17, 0  ;;  %p41_p4 = scmp.lt.s32.totalorder %s938_s20, 1 }
  0x10   : > { %p59_p5 = scmp.ne.s32.totalorder %s622_s13, %s618_s12  ;;  %p60_p7 = scmp.eq.s32.totalorder %s360_s18, 0 }
  0x11   : > { %p716_p6 = por %p54_p3, %p53_p2  ;;  %s101_s26 = ssub.s32 %s634_s16, %s938_s20 }
  0x12   : > { %s42_s24 = scalar_select %p41_p4, %s938_s20, 1 }
  0x13   : > { %p721_p8 = por %p60_p7, %p59_p5  ;;  %p102_p9 = scmp.eq.s32.totalorder %s101_s26, 0 }
  0x14   : > { %s43_s27 = ssub.s32 %s707_s22, %s42_s24  ;;  %s104_s28 = sadd.s32 1, %s614_s11 }
  0x15   : > { %s916_s25 = scalar_select %p721_p8, 1, 0 }
  0x16   : > { %p44_p10 = scmp.eq.s32.totalorder %s43_s27, 0  ;;  %p114_p11 = scmp.ne.s32.totalorder %s614_s11, %s610_s10 }
  0x17   : > { %s730_s29 = scalar_select %p102_p9, %s614_s11, %s104_s28  }
  0x18   : > { %s733_s30 = scalar_select %p44_p10, %s626_s14, %s46_s21  }
  0x19   : > { %p115_p12 = scmp.eq.s32.totalorder %s360_s18, 1  ;;  %p120_p13 = scmp.ne.s32.totalorder %s610_s10, %s606_s9 }
  0x1a   : > { %p121_p0 = scmp.eq.s32.totalorder %s361_s19, 1  ;;  %p393_p4 = scmp.lt.s32.totalorder %s638_s17, 2 }
  0x1b   : > { %p739_p1 = por %p115_p12, %p114_p11  ;;  %s750_s5 = sand.u32 1, %s626_s14  }
  0x1c   : > { %p744_p3 = por %p121_p0, %p120_p13  ;;  %s365_s6 = sshll.u32 %s707_s22, 7 }
  0x1d   : > { %s917_s3 = scalar_select %p739_p1, 1, 0 }
  0x1e   : > { %s918_s4 = scalar_select %p744_p3, 1, 0 }
  0x1f   : > { %s912_s7 = sshll.u32 %s750_s5, 3  ;;  %s759_s18 = scalar_lea.hbm %s909_s0, %s365_s6 }
  0x20   : > { %s145_s19 = scalar_lea.vmem [#allocation2], %s912_s7  ;;  %p765_p5 = pnand %p393_p4, %p716_p6 }
  0x21   : > { %s155_s21 = sshll.u32 %s145_s19, 4  ;;  %s142_s26 = scalar_lea.sflag [#allocation3], %s750_s5  ;;  %s769_s21 = int_to_ptr.vmem [resolvable:$true] %s155_s21 }
  0x22   : > { %s468_s27 = scalar_lea.hbm %s759_s18, 128  ;;  %p470_p11 = pneg %p765_p5 }
  0x23   : > { %p469_p10 = scmp.ne.s32.totalorder %s759_s18, %s468_s27  ;;  %s473_s8 = scalar_lea.hbm %s909_s0, 256 }
  0x24   : > { %p474_p6 = scmp.lt.u32.totalorder %s759_s18, %s909_s0  ;;  %p475_p0 = scmp.lt.u32.totalorder %s473_s8, %s468_s27 }
  0x25   : > { %p471_p12 = pnand %p470_p11, %p469_p10  ;;  %p477_p2 = scmp.lt.u32.totalorder %s468_s27, %s759_s18 }
  0x26   : > { %p476_p4 = por %p475_p0, %p474_p6 }
  0x27   : > { %p472_p13 = pneg %p471_p12 }
  0x28   : > { %p478_p7 = por %p477_p2, %p476_p4 }
  0x2a   : > { %p479_p9 = pnand %p478_p7, %p472_p13 }
  0x2c   : > { %482 = shalt.err (!%p479_p9)
}
  0x2d   : > { %s483_s7 = scalar_lea.vmem %s769_s21, 128  ;;  %s640_s23 = smov [#allocation2]  }
  0x2e   : > { %p484_p10 = scmp.ne.s32.totalorder %s769_s21, %s483_s7  ;;  %s488_s28 = sshll.u32 %s640_s23, 4  ;;  %s489_s28 = int_to_ptr.vmem [resolvable:$false] %s488_s28 }
  0x2f   : > { %s490_s12 = scalar_lea.vmem %s489_s28, 256  ;;  %p491_p1 = scmp.lt.s32.totalorder %s769_s21, %s489_s28 }
  0x30   : > { %p486_p12 = pnand %p484_p10, %p470_p11  ;;  %p492_p6 = scmp.lt.s32.totalorder %s490_s12, %s483_s7 }
  0x32   : > { %p487_p3 = pneg %p486_p12  ;;  %p493_p0 = por %p492_p6, %p491_p1 }
  0x34   : > { %p494_p2 = pnand %p493_p0, %p487_p3 }
  0x36   : > { %497 = shalt.err (!%p494_p2)
}
  0x37   : > { %385 = dma.hbm_to_vmem [thread:$0]  (!%p765_p5), %s759_s18, 128, %s769_s21, %s142_s26  }
  0x38   : > { %p920_p7 = scmp.lt.s32.totalorder %s638_s17, 3  ;;  %p921_p9 = scmp.ge.s32.totalorder %s638_s17, 1 }
  0x39   : > { %s812_s19 = scalar_lea.hbm %s910_s1, %s365_s6  ;;  %s923_s23 = sshll.u32 %s750_s5, 3 }
  0x3a   : > { %p803_p13 = pnand %p921_p9, %p920_p7  ;;  %s166_s28 = scalar_lea.vmem [#allocation5], %s923_s23 }
  0x3b   : > { %s176_s12 = sshll.u32 %s166_s28, 4  ;;  %s163_s18 = scalar_lea.sflag [#allocation6], %s750_s5  ;;  %s177_s12 = int_to_ptr.vmem [resolvable:$true] %s176_s12 }
  0x3c   : > { %s922_s27 = scalar_select %p803_p13, 1, 0 }
  0x3d   : > { %s498_s21 = scalar_lea.hbm %s812_s19, 128  ;;  %s503_s6 = scalar_lea.hbm %s910_s1, 256 }
  0x3e   : > { %p499_p1 = scmp.ne.s32.totalorder %s812_s19, %s498_s21  ;;  %p504_p10 = scmp.lt.u32.totalorder %s812_s19, %s910_s1 }
  0x3f   : > { %p505_p12 = scmp.lt.u32.totalorder %s503_s6, %s498_s21  ;;  %p507_p0 = scmp.lt.u32.totalorder %s498_s21, %s812_s19 }
  0x40   : > { %p501_p3 = pnand %p499_p1, %p470_p11 }
  0x41   : > { %p506_p6 = por %p505_p12, %p504_p10 }
  0x42   : > { %p502_p4 = pneg %p501_p3 }
  0x43   : > { %p508_p2 = por %p507_p0, %p506_p6 }
  0x45   : > { %p509_p7 = pnand %p508_p2, %p502_p4 }
  0x47   : > { %512 = shalt.err (!%p509_p7)
}
  0x48   : > { %s513_s5 = scalar_lea.vmem %s177_s12, 128  ;;  %s641_s23 = smov [#allocation5]  }
  0x49   : > { %p514_p9 = scmp.ne.s32.totalorder %s177_s12, %s513_s5  ;;  %s518_s28 = sshll.u32 %s641_s23, 4  ;;  %s519_s28 = int_to_ptr.vmem [resolvable:$false] %s518_s28 }
  0x4a   : > { %s520_s22 = scalar_lea.vmem %s519_s28, 256  ;;  %p521_p8 = scmp.lt.s32.totalorder %s177_s12, %s519_s28 }
  0x4b   : > { %p516_p1 = pnand %p514_p9, %p470_p11  ;;  %p522_p13 = scmp.lt.s32.totalorder %s520_s22, %s513_s5 }
  0x4d   : > { %p517_p3 = pneg %p516_p1  ;;  %p523_p10 = por %p522_p13, %p521_p8 }
  0x4f   : > { %p524_p12 = pnand %p523_p10, %p517_p3 }
  0x51   : > { %527 = shalt.err (!%p524_p12)
}
  0x52   : > { %388 = dma.hbm_to_vmem [thread:$0]  (!%p765_p5), %s812_s19, 128, %s177_s12, %s163_s18  }
  0x53   : > { %p924_p4 = scmp.ne.s32.totalorder %s922_s27, 0 }
  0x54   : > { %s187_s21 = sand.u32 (!%p924_p4), 1, %s622_s13   ;;  %p925_p11 = scmp.ne.s32.totalorder (!%p924_p4), %s916_s25, 0 }
  0x55   : > { %185 = sbr.rel (%p924_p4) target bundleno = 121 (0x79), region = 28  ;;  %s369_s26 = sshll.u32 (!%p924_p4), %s187_s21, 3 }
  0x56   : > { %s188_s6 = scalar_lea.sflag (!%p924_p4), [#allocation3], %s187_s21  ;;  %s191_s7 = scalar_lea.vmem (!%p924_p4), [#allocation2], %s369_s26 }
  0x5c   : > { %593 = dma.done.wait (%p925_p11), %s188_s6, 128  }
  0x5d   : > { %595 = vsyncadd (%p925_p11), %s188_s6, 4294967168  ;;  %s197_s8 = scalar_lea.sflag [#allocation6], %s187_s21  ;;  %s200_s5 = scalar_lea.vmem [#allocation5], %s369_s26 }
  0x5e   : > { %597 = dma.done.wait (%p925_p11), %s197_s8, 128  }
  0x5f   : > { %599 = vsyncadd (%p925_p11), %s197_s8, 4294967168  ;;  %s223_s24 = sand.u32 1, %s610_s10   ;;  %v237_v0 = vld [vmem:[%s191_s7] sm:$0xff]  ;;  %v238_v1 = vld [vmem:[%s200_s5] sm:$0xff]  ;;  %s373_s19 = sshll.u32 %s630_s15, 7 }
  0x60   : > { %s371_s27 = sshll.u32 %s223_s24, 3  ;;  %v239_v2 = vsub.f32 %v237_v0, %v238_v1  ;;  %s852_s22 = scalar_lea.hbm %s911_s2, %s373_s19 }
  0x61   : > { %s225_s12 = scalar_lea.vmem [#allocation7], %s371_s27  ;;  %s246_s25 = scalar_lea.sflag [#allocation4], %s223_s24 }
  0x62   : > { %s259_s18 = sshll.u32 %s225_s12, 4  ;;  %v240_v3 = vmul.f32 %v239_v2, %v239_v2  ;;  %p926_p5 = scmp.ne.s32.totalorder %s917_s3, 0  ;;  %s854_s18 = int_to_ptr.vmem [resolvable:$true] %s259_s18 }
  0x63   : > { %s528_s21 = scalar_lea.vmem %s854_s18, 128  ;;  %s642_s15 = smov [#allocation7]  }
  0x64   : > { %244 = vst [vmem:[%s225_s12] sm:$0xff] %v240_v3  ;;  %p529_p8 = scmp.ne.s32.totalorder %s854_s18, %s528_s21  ;;  %s532_s26 = sshll.u32 %s642_s15, 4  ;;  %s533_s26 = int_to_ptr.vmem [resolvable:$false] %s532_s26 }
  0x65   : > { %s534_s6 = scalar_lea.vmem %s533_s26, 256  ;;  %p535_p0 = scmp.lt.s32.totalorder %s854_s18, %s533_s26 }
  0x66   : > { %p530_p13 = pnand %p529_p8, %p926_p5  ;;  %p536_p2 = scmp.lt.s32.totalorder %s534_s6, %s528_s21 }
  0x68   : > { %p531_p6 = pneg %p530_p13  ;;  %p537_p7 = por %p536_p2, %p535_p0 }
  0x6a   : > { %p538_p9 = pnand %p537_p7, %p531_p6 }
  0x6c   : > { %541 = shalt.err (!%p538_p9)
}
  0x6d   : > { %s542_s7 = scalar_lea.hbm %s852_s22, 128  ;;  %s546_s24 = scalar_lea.hbm %s911_s2, 256 }
  0x6e   : > { %p543_p1 = scmp.ne.s32.totalorder %s852_s22, %s542_s7  ;;  %p547_p12 = scmp.lt.u32.totalorder %s852_s22, %s911_s2 }
  0x6f   : > { %p548_p4 = scmp.lt.u32.totalorder %s546_s24, %s542_s7  ;;  %p550_p8 = scmp.lt.u32.totalorder %s542_s7, %s852_s22 }
  0x70   : > { %p544_p3 = pnand %p543_p1, %p926_p5 }
  0x71   : > { %p549_p11 = por %p548_p4, %p547_p12 }
  0x72   : > { %p545_p10 = pneg %p544_p3 }
  0x73   : > { %p551_p13 = por %p550_p8, %p549_p11 }
  0x75   : > { %p552_p6 = pnand %p551_p13, %p545_p10 }
  0x77   : > { %555 = shalt.err (!%p552_p6)
}
  0x78   : > { %380 = dma.vmem_to_hbm [thread:$0]  (%p926_p5), %s854_s18, 128, %s852_s22, %s246_s25  }
  0x79 PF: > { %s271_s12 = sand.u32 1, %s606_s9   ;;  %p927_p0 = scmp.ne.s32.totalorder %s918_s4, 0 }
  0x7a   : > { %p928_p2 = scmp.ge.s32.totalorder %s638_s17, 2  ;;  %s272_s23 = scalar_lea.sflag [#allocation4], %s271_s12 }
  0x7c   : > { %p390_p7 = pnand %p928_p2, %p927_p0 }
  0x7e   : > { %601 = dma.done.wait (!%p390_p7), %s272_s23, 128  }
  0x7f   : > { %603 = vsyncadd (!%p390_p7), %s272_s23, 4294967168  ;;  %s21_s17 = sadd.s32 1, %s638_s17   ;;  %s929_s9 = smov %s610_s10 }
  0x80   : > { %p18_p9 = scmp.ge.s32.totalorder %s21_s17, 4   ;;  %s930_s10 = smov %s614_s11 }
  0x81   : > { %s931_s11 = smov %s730_s29  ;;  %s932_s12 = smov %s622_s13 }
  0x82   : > { %s933_s13 = smov %s626_s14  ;;  %s934_s14 = smov %s733_s30 }
  0x83   : > { %s935_s15 = smov %s634_s16  ;;  %s936_s16 = smov %s938_s20 }
  0x84   :  { %20 = sbr.rel (!%p18_p9) target bundleno = 10 (0xa), region = 90 }
  0x8b   :  { %277 = vsyncpa [#allocation3], 1 }
  0x8c   :  { %279 = vsyncpa [#allocation3 + $0x1], 1 }
  0x8d   :  { %280 = vsyncpa [#allocation6], 1 }
  0x8e   :  { %282 = vsyncpa [#allocation6 + $0x1], 1 }
  0x8f   :  { %283 = vsyncpa [#allocation4], 1 }
  0x90   :  { %285 = vsyncpa [#allocation4 + $0x1], 1 }

</bundles_post_ra>
